<compile_context>
chip_gen: v6e
topology: v6e:2x2x1
jax: 0.10.0
libtpu: 0.0.40
codegen_flags: <defaults>
</compile_context>

<pallas_src>
import functools

import jax
import jax.numpy as jnp
from jax.experimental import pallas as pl
from jax.experimental.pallas import tpu as pltpu


def _rmsnorm_kernel(x_ref, w_ref, o_ref, *, eps, hidden, lane_padded):
    # x_ref: (tile, hidden_p) block; w_ref: (1, hidden_p) resident weight row.
    x = x_ref[...].astype(jnp.float32)                       # .to(float32)
    if lane_padded:
        # Zero-padded lanes don't change sum(x^2); divide by the true hidden.
        var = jnp.sum(x * x, axis=-1, keepdims=True) * (1.0 / hidden)
    else:
        var = jnp.mean(x * x, axis=-1, keepdims=True)         # pow(2).mean(-1)
    inv = jax.lax.rsqrt(var + eps)                            # EUP rsqrt
    normed = (x * inv).astype(x_ref.dtype)                    # .to(input_dtype)
    # weight * normed: jnp promotion matches torch; single cast at the store.
    o_ref[...] = (w_ref[...] * normed).astype(o_ref.dtype)


def _round_up(x, m):
    return ((x + m - 1) // m) * m


def llama_rmsnorm(hidden_states, weight, eps=1e-6, *, row_tile=None):
    """RMSNorm over the last axis. hidden_states: (..., hidden)."""
    orig_shape = hidden_states.shape
    hidden = orig_shape[-1]
    in_dtype = hidden_states.dtype
    out_dtype = jnp.result_type(weight.dtype, in_dtype)   # torch promotion parity

    x2d = hidden_states.reshape(-1, hidden)
    rows = x2d.shape[0]

    # Lane-density guard (cheap insurance; real Llama hidden sizes skip this).
    hidden_p = _round_up(hidden, 128)
    lane_padded = hidden_p != hidden
    if lane_padded:
        x2d = jnp.pad(x2d, ((0, 0), (0, hidden_p - hidden)))
        w2d = jnp.pad(weight.reshape(1, hidden), ((0, 0), (0, hidden_p - hidden)))
    else:
        w2d = weight.reshape(1, hidden)

    x_bytes = jnp.dtype(in_dtype).itemsize
    o_bytes = jnp.dtype(out_dtype).itemsize
    w_bytes = jnp.dtype(weight.dtype).itemsize

    # Sublane packing minimum: 8 rows f32 / 16 bf16 / 32 int8-fp8.
    min_tile = 8 * max(1, 4 // x_bytes)

    # Generation-aware VMEM budget (per-TC physical capacity).
    try:
        vmem_cap = int(pltpu.get_tpu_info().vmem_capacity_bytes)
    except Exception:
        vmem_cap = 64 << 20  # conservative fallback
    if vmem_cap >= (100 << 20):   # 128 MiB parts: v5e / v6e -> 1 TensorCore
        block_budget = 64 << 20
        num_tc = 1
    else:                         # 64 MiB parts: v7x -> 2 TensorCores
        block_budget = 32 << 20
        num_tc = 2

    # Per-row VMEM cost: double-buffered in + out blocks plus the in-kernel
    # f32 working set (upcast + one temporary) ~= 2 * 4 bytes per element.
    per_row_bytes = hidden_p * (2 * x_bytes + 2 * o_bytes + 2 * 4)
    max_tile_by_vmem = max(min_tile, block_budget // per_row_bytes)

    target = row_tile if row_tile is not None else 512
    tile = max(min_tile, (min(target, max_tile_by_vmem) // min_tile) * min_tile)
    # Never allocate a block larger than the (sublane-rounded) row count.
    tile = min(tile, _round_up(rows, min_tile))

    # On 2-TC parts keep >= 4 grid steps so each TensorCore still double-buffers
    # after megacore sharding; skip on 1-TC parts (pure overhead there).
    if num_tc >= 2 and rows >= 4 * min_tile:
        tile = min(tile, max(min_tile, _round_up(pl.cdiv(rows, 4), min_tile)))

    grid = (pl.cdiv(rows, tile),)   # ragged last block handled by Pallas

    vmem_limit = tile * per_row_bytes + 2 * hidden_p * w_bytes + (1 << 20)
    vmem_limit = int(min(max(vmem_limit, 4 << 20), (vmem_cap * 9) // 10))

    cost = pl.CostEstimate(
        flops=4 * rows * hidden_p,
        transcendentals=rows,
        bytes_accessed=rows * hidden_p * (x_bytes + o_bytes) + hidden_p * w_bytes,
    )

    out = pl.pallas_call(
        functools.partial(_rmsnorm_kernel, eps=eps, hidden=hidden,
                          lane_padded=lane_padded),
        out_shape=jax.ShapeDtypeStruct((rows, hidden_p), out_dtype),
        grid_spec=pltpu.PrefetchScalarGridSpec(
            num_scalar_prefetch=0,
            grid=grid,
            in_specs=[
                pl.BlockSpec((tile, hidden_p), lambda i: (i, 0)),
                pl.BlockSpec((1, hidden_p), lambda i: (0, 0)),
            ],
            out_specs=pl.BlockSpec((tile, hidden_p), lambda i: (i, 0)),
        ),
        compiler_params=pltpu.CompilerParams(
            dimension_semantics=("parallel",),
            vmem_limit_bytes=vmem_limit,
        ),
        cost_estimate=cost,
    )(x2d, w2d)

    if lane_padded:
        out = out[:, :hidden]
    return out.reshape(orig_shape)


def rmsnorm_reference(hidden_states, weight, eps=1e-6):
    input_dtype = hidden_states.dtype
    x = hidden_states.astype(jnp.float32)
    variance = jnp.mean(x * x, axis=-1, keepdims=True)
    x = x * jax.lax.rsqrt(variance + eps)
    # Torch: weight * x.to(input_dtype) with standard promotion (no forced downcast).
    return weight * x.astype(input_dtype)


if __name__ == "__main__":
    eps = 1e-6
    key = jax.random.PRNGKey(0)

    # Test 1: small f32 case (batch=2, seq=8, hidden=32 -> lane-padded path).
    batch, seq, hidden = 2, 8, 32
    k1, k2 = jax.random.split(key)
    x = jax.random.normal(k1, (batch, seq, hidden), dtype=jnp.float32)
    weight = jnp.ones((hidden,), dtype=jnp.float32)  # nn.Parameter(torch.ones(h))

    out = jax.block_until_ready(llama_rmsnorm(x, weight, eps=eps))
    ref = rmsnorm_reference(x, weight, eps=eps)
    assert out.shape == x.shape
    assert out.dtype == ref.dtype
    assert jnp.allclose(out, ref, atol=1e-5, rtol=1e-5)

    # Test 2: bf16 activations, f32 weight, ragged row count (15 rows),
    # hidden already a 128-multiple -> exercises partial-block + promotion.
    x2 = jax.random.normal(k2, (3, 5, 256), dtype=jnp.bfloat16)
    w2 = jnp.ones((256,), dtype=jnp.float32)
    out2 = jax.block_until_ready(llama_rmsnorm(x2, w2, eps=eps))
    ref2 = rmsnorm_reference(x2, w2, eps=eps)
    assert out2.shape == x2.shape
    assert out2.dtype == jnp.float32  # torch promotion: f32 weight * bf16 -> f32
    assert jnp.allclose(out2, ref2, atol=1e-3, rtol=1e-3)

    print("KERNEL_OK")
</pallas_src>

<mosaic_0001>
module attributes {stable_mosaic.version = 11 : i64} {
  func.func @_rmsnorm_kernel(%arg0: i32, %arg1: memref<16x128xf32, #tpu.memory_space<vmem>>, %arg2: memref<1x128xf32, #tpu.memory_space<vmem>>, %arg3: memref<16x128xf32, #tpu.memory_space<vmem>>) attributes {dimension_semantics = [#tpu.dimension_semantics<parallel>], iteration_bounds = array<i64: 1>, scalar_prefetch = 0 : i64, scratch_operands = 0 : i64, tpu.core_type = #tpu.core_type<tc>, window_params = [{transform_indices = @transform_0, window_bounds = array<i64: 16, 128>}, {pipeline_mode = #tpu.pipeline_mode<synchronous>, transform_indices = @transform_1, window_bounds = array<i64: 1, 128>}, {transform_indices = @transform_2, window_bounds = array<i64: 16, 128>}]} {
    %c0 = arith.constant 0 : index
    %c0_0 = arith.constant 0 : index
    %0 = vector.load %arg1[%c0, %c0_0] : memref<16x128xf32, #tpu.memory_space<vmem>>, vector<16x128xf32>
    %1 = arith.mulf %0, %0 : vector<16x128xf32>
    %cst = arith.constant dense<0.000000e+00> : vector<16xf32>
    %2 = vector.multi_reduction <add>, %1, %cst [1] : vector<16x128xf32> to vector<16xf32>
    %3 = vector.shape_cast %2 : vector<16xf32> to vector<16x1xf32>
    %cst_1 = arith.constant 3.125000e-02 : f32
    %4 = vector.broadcast %cst_1 : f32 to vector<16x1xf32>
    %5 = arith.mulf %3, %4 : vector<16x1xf32>
    %cst_2 = arith.constant 9.99999997E-7 : f32
    %6 = vector.broadcast %cst_2 : f32 to vector<16x1xf32>
    %7 = arith.addf %5, %6 : vector<16x1xf32>
    %8 = math.rsqrt %7 : vector<16x1xf32>
    %9 = vector.broadcast %8 : vector<16x1xf32> to vector<16x128xf32>
    %10 = arith.mulf %0, %9 : vector<16x128xf32>
    %c0_3 = arith.constant 0 : index
    %c0_4 = arith.constant 0 : index
    %11 = vector.load %arg2[%c0_3, %c0_4] : memref<1x128xf32, #tpu.memory_space<vmem>>, vector<1x128xf32>
    %12 = vector.broadcast %11 : vector<1x128xf32> to vector<16x128xf32>
    %13 = arith.mulf %12, %10 : vector<16x128xf32>
    %c0_5 = arith.constant 0 : index
    %c0_6 = arith.constant 0 : index
    %14 = vector.load %arg3[%c0_5, %c0_6] : memref<16x128xf32, #tpu.memory_space<vmem>>, vector<16x128xf32>
    tpu.vector_store %arg3[%c0_5, %c0_6], %13 {strides = array<i32>} : memref<16x128xf32, #tpu.memory_space<vmem>>, vector<16x128xf32>,
    return
  }
  func.func @transform_0(%arg0: i32) -> (i32, i32) {
    %c0_i32 = arith.constant 0 : i32
    %c0_i32_0 = arith.constant 0 : i32
    return %arg0, %c0_i32 : i32, i32
  }
  func.func @transform_1(%arg0: i32) -> (i32, i32) {
    %c0_i32 = arith.constant 0 : i32
    %c0_i32_0 = arith.constant 0 : i32
    %c0_i32_1 = arith.constant 0 : i32
    return %c0_i32, %c0_i32_0 : i32, i32
  }
  func.func @transform_2(%arg0: i32) -> (i32, i32) {
    %c0_i32 = arith.constant 0 : i32
    %c0_i32_0 = arith.constant 0 : i32
    return %arg0, %c0_i32 : i32, i32
  }
}

</mosaic_0001>

<bundles_post_ra>
// kernel: tpu_custom_call.1
= control target key start
LH: loop header
LB: loop body
LE: loop exit
PB: predicated region body
PF: predicated region fallthrough
CT: control target
= control target key end

     0   :  { %7 = vsyncpa [#allocation3], 0  ;;  %s157_s0 = inlined_call_operand.hbm [shape: f32[16,128], index: 0, kind: input, shape index: {}]   ;;  %s158_s1 = inlined_call_operand.vmem [shape: f32[1,128], index: 1, kind: input, shape index: {}]   ;;  %s159_s2 = inlined_call_operand.hbm [shape: f32[16,128], index: 2, kind: output, shape index: {}]  }
   0x1   :  { %8 = vsyncpa [#allocation4], 0  ;;  %s123_s9 = smov [#allocation2]  }
   0x2   :  { %s14_s10 = sshll.u32 %s123_s9, 4  ;;  %s15_s10 = int_to_ptr.vmem [resolvable:$true] %s14_s10 }
   0x3   :  { %s87_s11 = scalar_lea.vmem %s15_s10, 256  ;;  %p92_p1 = scmp.lt.s32.totalorder %s15_s10, %s15_s10 }
   0x4   :  { %p88_p0 = scmp.ne.s32.totalorder %s15_s10, %s87_s11  ;;  %p93_p2 = scmp.lt.s32.totalorder %s87_s11, %s87_s11 }
   0x6   :  { %p94_p3 = por %p93_p2, %p92_p1 }
   0x8   :  { %p95_p4 = pnand %p94_p3, %p88_p0 }
   0xa   :  { %98 = shalt.err (!%p95_p4)
}
   0xb   :  { %s124_s12 = smov 128   ;;  %s125_s13 = smov 8  }
   0xc   :  { %20 = dma.hbm_to_vmem [thread:$0]  %s157_s0, 256, %s15_s10, [#allocation3], %s124_s12, %s124_s12, %s125_s13  }
   0xd   :  { %119 = dma.done.wait [#allocation3], 256  }
   0xe   :  { %120 = vsyncadd [#allocation3], 4294967040  ;;  %v26_v0 = vld [vmem:[#allocation2] sm:$0xff]  ;;  %v27_v1 = vld [vmem:[#allocation2 + $0x8] sm:$0xff]  ;;  %s126_s0 = smov [#allocation5]  }
   0xf   :  { %v28_v2 = vmul.f32 %v26_v0, %v26_v0  ;;  %v29_v3 = vmul.f32 %v27_v1, %v27_v1  ;;  %v70_v11 = vld [vmem:[%s158_s1] ss:$0 sm:$0xff]  ;;  %s58_s18 = sshll.u32 %s126_s0, 4  ;;  %s59_s18 = int_to_ptr.vmem [resolvable:$true] %s58_s18 }
  0x10   :  { %s99_s19 = scalar_lea.vmem %s59_s18, 256  ;;  %p104_p6 = scmp.lt.s32.totalorder %s59_s18, %s59_s18 }
  0x11   :  { %30 = vadd.xlane.f32.xlu0 %v28_v2  ;;  %p100_p5 = scmp.ne.s32.totalorder %s59_s18, %s99_s19  ;;  %p105_p7 = scmp.lt.s32.totalorder %s99_s19, %s99_s19 }
  0x13   :  { %p106_p8 = por %p105_p7, %p104_p6 }
  0x15   :  { %32 = vadd.xlane.f32.xlu0 %v29_v3  ;;  %p107_p9 = pnand %p106_p8, %p100_p5 }
  0x9a   :  { %v31_v4 = vpop.xlane.xlu0 %30 }
  0x9b   :  { %v34_v5 = vmul.f32 0.03125, %v31_v4 }
  0x9d   :  { %v36_v6 = vadd.f32 1e-06, %v34_v5 }
  0x9e   :  { %v33_v7 = vpop.xlane.xlu0 %32 }
  0x9f   :  { %75 = vrsqrt.f32 %v36_v6  ;;  %v35_v8 = vmul.f32 0.03125, %v33_v7 }
  0xa1   :  { %v37_v9 = vadd.f32 1e-06, %v35_v8 }
  0xa3   :  { %77 = vrsqrt.f32 %v37_v9 }
  0xac   :  { %v76_v10 = vpop.eup %75 }
  0xad   :  { %v40_v12 = vmul.f32 %v76_v10, %v26_v0 }
  0xaf   :  { %v49_v13 = vmul.f32 %v70_v11, %v40_v12 }
  0xb0   :  { %v78_v14 = vpop.eup %77 }
  0xb1   :  { %v41_v15 = vmul.f32 %v78_v14, %v27_v1  ;;  %51 = vst [vmem:[#allocation5] sm:$0xff] %v49_v13 }
  0xb3   :  { %v50_v16 = vmul.f32 %v70_v11, %v41_v15 }
  0xb5   :  { %52 = vst [vmem:[#allocation5 + $0x8] sm:$0xff] %v50_v16 }
  0xb6   :  { %110 = shalt.err (!%p107_p9)
}
  0xb7   :  { %64 = dma.vmem_to_hbm [thread:$0]  %s59_s18, 256, %s159_s2, [#allocation4], %s124_s12, %s124_s12, %s125_s13  }
  0xb8   :  { %121 = dma.done.wait [#allocation4], 256  }
  0xb9   :  { %122 = vsyncadd [#allocation4], 4294967040 }
  0xba   :  { %68 = vsyncpa [#allocation3], 1 }
  0xbb   :  { %69 = vsyncpa [#allocation4], 1 }

</bundles_post_ra>
